<compile_context>
chip_gen: v6e
topology: v6e:2x2x1
jax: 0.10.0
libtpu: 0.0.40
codegen_flags: <defaults>
</compile_context>

<pallas_src>
import jax
import jax.numpy as jnp
from jax.experimental import pallas as pl
from jax.experimental.pallas import tpu as pltpu


def _round_up(n: int, m: int) -> int:
    return ((n + m - 1) // m) * m


def linear_kernel(x_ref, w_ref, b_ref, o_ref):
    """One batch tile of y = x @ W.T + b (out_features == 1).

    x_ref: (TM, D) VMEM  - current batch tile of x (double-buffered by Pallas)
    w_ref: (1, D)  VMEM  - weight row, resident across all grid steps
    b_ref: (1,)    SMEM  - bias scalar
    o_ref: (TM, 1) VMEM  - output tile
    """
    # VPU elementwise multiply (f32 accumulate even if inputs are bf16),
    # then XLU lane reduction. No MXU involved.
    x = x_ref[...].astype(jnp.float32)
    w = w_ref[...].astype(jnp.float32)               # (1, D), broadcast over sublanes
    acc = jnp.sum(x * w, axis=-1, keepdims=True)     # (TM, 1) f32
    o_ref[...] = (acc + b_ref[0]).astype(o_ref.dtype)


def linear_forward(x, w, b, *, max_block_rows: int = 1024):
    """y = x @ w.T + b with torch-style w of shape (1, D), b of shape (1,).

    x may be f32 or bf16 (bf16 halves HBM reads; accumulation stays f32).
    Returns a (B, 1) f32 array.
    """
    B, D = x.shape
    assert w.shape == (1, D)
    assert b.shape == (1,)

    # Tile the batch. Keep double-buffered (TM, D) x tiles under ~16 MiB so the
    # kernel fits v7x's 64 MiB physical / 32 MiB scoped VMEM with headroom.
    bytes_per_elem = jnp.dtype(x.dtype).itemsize
    vmem_budget = 16 * 1024 * 1024
    rows_by_vmem = max(8, (vmem_budget // (2 * D * bytes_per_elem)) // 8 * 8)
    tm = min(max_block_rows, rows_by_vmem, _round_up(B, 8))

    b_pad = _round_up(B, tm)
    if b_pad != B:
        x = jnp.pad(x, ((0, b_pad - B), (0, 0)))
    num_tiles = b_pad // tm

    out = pl.pallas_call(
        linear_kernel,
        out_shape=jax.ShapeDtypeStruct((b_pad, 1), jnp.float32),
        grid=(num_tiles,),
        in_specs=[
            # x: one (TM, D) tile per grid step -> auto double-buffered.
            pl.BlockSpec((tm, D), lambda i: (i, 0)),
            # w: same block every step -> stays resident in VMEM (one HBM fetch).
            pl.BlockSpec((1, D), lambda i: (0, 0)),
            # b: scalar in SMEM (no padded VMEM tile, scalar add in kernel).
            pl.BlockSpec(memory_space=pltpu.MemorySpace.SMEM),
        ],
        out_specs=pl.BlockSpec((tm, 1), lambda i: (i, 0)),
        compiler_params=pltpu.CompilerParams(
            # Batch rows are independent -> shard across both TCs on v7x.
            dimension_semantics=("parallel",),
        ),
    )(x, w, b)
    return out[:B]


if __name__ == "__main__":
    # Shapes consistent with LinearModel(input_size=32), batch=8. At this size
    # the run is 100% fixed overhead; the grid/tiling above is for scaled-up B.
    batch, input_size = 8, 32

    key = jax.random.PRNGKey(0)
    kx, kw, kb = jax.random.split(key, 3)

    x = jax.random.normal(kx, (batch, input_size), dtype=jnp.float32)

    # Deterministic params mimicking nn.Linear's U(-1/sqrt(D), 1/sqrt(D)).
    bound = 1.0 / jnp.sqrt(jnp.float32(input_size))
    w = jax.random.uniform(kw, (1, input_size), jnp.float32, -bound, bound)  # torch (out, in)
    b = jax.random.uniform(kb, (1,), jnp.float32, -bound, bound)

    y = linear_forward(x, w, b)
    y = jax.block_until_ready(y)

    # Pure-JAX reference (same semantics as torch: x @ W.T + b).
    y_ref = x @ w.T + b
    assert y.shape == (batch, 1)
    assert jnp.allclose(y, y_ref, atol=1e-5, rtol=1e-5)

    print("KERNEL_OK")
</pallas_src>

<mosaic_0001>
module attributes {stable_mosaic.version = 11 : i64} {
  func.func @linear_kernel(%arg0: i32, %arg1: memref<8x32xf32, #tpu.memory_space<vmem>>, %arg2: memref<1x32xf32, #tpu.memory_space<vmem>>, %arg3: memref<1xf32, #tpu.memory_space<smem>>, %arg4: memref<8x1xf32, #tpu.memory_space<vmem>>) attributes {dimension_semantics = [#tpu.dimension_semantics<parallel>], iteration_bounds = array<i64: 1>, scalar_prefetch = 0 : i64, scratch_operands = 0 : i64, tpu.core_type = #tpu.core_type<tc>, window_params = [{transform_indices = @transform_0, window_bounds = array<i64: 8, 32>}, {pipeline_mode = #tpu.pipeline_mode<synchronous>, transform_indices = @transform_1, window_bounds = array<i64: 1, 32>}, {transform_indices = @transform_2, window_bounds = array<i64: 1>}, {transform_indices = @transform_3, window_bounds = array<i64: 8, 1>}]} {
    %c0 = arith.constant 0 : index
    %c0_0 = arith.constant 0 : index
    %0 = vector.load %arg1[%c0, %c0_0] : memref<8x32xf32, #tpu.memory_space<vmem>>, vector<8x32xf32>
    %c0_1 = arith.constant 0 : index
    %c0_2 = arith.constant 0 : index
    %1 = vector.load %arg2[%c0_1, %c0_2] : memref<1x32xf32, #tpu.memory_space<vmem>>, vector<1x32xf32>
    %2 = vector.broadcast %1 : vector<1x32xf32> to vector<8x32xf32>
    %3 = arith.mulf %0, %2 : vector<8x32xf32>
    %cst = arith.constant dense<0.000000e+00> : vector<8xf32>
    %4 = vector.multi_reduction <add>, %3, %cst [1] : vector<8x32xf32> to vector<8xf32>
    %5 = vector.shape_cast %4 : vector<8xf32> to vector<8x1xf32>
    %c0_3 = arith.constant 0 : index
    %6 = memref.load %arg3[%c0_3] : memref<1xf32, #tpu.memory_space<smem>>
    %7 = vector.broadcast %6 : f32 to vector<8x1xf32>
    %8 = arith.addf %5, %7 : vector<8x1xf32>
    %c0_4 = arith.constant 0 : index
    %c0_5 = arith.constant 0 : index
    %9 = vector.load %arg4[%c0_4, %c0_5] : memref<8x1xf32, #tpu.memory_space<vmem>>, vector<8x1xf32>
    tpu.vector_store %arg4[%c0_4, %c0_5], %8 {strides = array<i32>} : memref<8x1xf32, #tpu.memory_space<vmem>>, vector<8x1xf32>,
    return
  }
  func.func @transform_0(%arg0: i32) -> (i32, i32) {
    %c0_i32 = arith.constant 0 : i32
    %c0_i32_0 = arith.constant 0 : i32
    return %arg0, %c0_i32 : i32, i32
  }
  func.func @transform_1(%arg0: i32) -> (i32, i32) {
    %c0_i32 = arith.constant 0 : i32
    %c0_i32_0 = arith.constant 0 : i32
    %c0_i32_1 = arith.constant 0 : i32
    return %c0_i32, %c0_i32_0 : i32, i32
  }
  func.func @transform_2(%arg0: i32) -> i32 {
    %c0_i32 = arith.constant 0 : i32
    %c0_i32_0 = arith.constant 0 : i32
    return %c0_i32 : i32
  }
  func.func @transform_3(%arg0: i32) -> (i32, i32) {
    %c0_i32 = arith.constant 0 : i32
    %c0_i32_0 = arith.constant 0 : i32
    return %arg0, %c0_i32 : i32, i32
  }
}

</mosaic_0001>

<bundles_post_ra>
// kernel: tpu_custom_call.1
= control target key start
LH: loop header
LB: loop body
LE: loop exit
PB: predicated region body
PF: predicated region fallthrough
CT: control target
= control target key end

     0   :  { %9 = vsyncpa [#allocation4], 0  ;;  %s74_s12 = smov [#allocation3]   ;;  %s107_s0 = inlined_call_operand.hbm [shape: f32[8,32], index: 0, kind: input, shape index: {}]   ;;  %s108_s1 = inlined_call_operand.vmem [shape: f32[1,32], index: 1, kind: input, shape index: {}]   ;;  %s109_s2 = inlined_call_operand.<no memory space> [shape: f32[1], index: 2, kind: input, shape index: {}]   ;;  %s110_s3 = inlined_call_operand.vmem [shape: f32[8,1], index: 3, kind: output, shape index: {}]  }
   0x1   :  { %s16_s13 = sshll.u32 %s74_s12, 4  ;;  %s17_s13 = int_to_ptr.vmem [resolvable:$true] %s16_s13 }
   0x2   :  { %s60_s14 = scalar_lea.vmem %s17_s13, 128  ;;  %p65_p1 = scmp.lt.s32.totalorder %s17_s13, %s17_s13 }
   0x3   :  { %p61_p0 = scmp.ne.s32.totalorder %s17_s13, %s60_s14  ;;  %p66_p2 = scmp.lt.s32.totalorder %s60_s14, %s60_s14 }
   0x5   :  { %p67_p3 = por %p66_p2, %p65_p1 }
   0x7   :  { %p68_p4 = pnand %p67_p3, %p61_p0 }
   0x9   :  { %71 = shalt.err (!%p68_p4)
}
   0xa   :  { %19 = dma.hbm_to_vmem [thread:$0]  %s107_s0, 128, %s17_s13, [#allocation4]  }
   0xb   :  { %72 = dma.done.wait [#allocation4], 128  }
   0xc   :  { %73 = vsyncadd [#allocation4], 4294967168  ;;  %v27_v0 = vld [vmem:[#allocation3] sm:$0xff]  ;;  %vm36_vm0 = vcmask 261120   ;;  %v41_v4 = vstv %s109_s2  ;;  %vm43_vm1 = vcmask 7168  }
   0xd   :  { %v50_v1 = vld [vmem:[%s108_s1] ss:$0 sm:$0xff] }
   0xe   :  { %v35_v2 = vmul.f32 %v50_v1, %v27_v0 }
  0x10   :  { %v37_v3 = vsel %vm36_vm0, %v35_v2, 0.0 }
  0x11   :  { %38 = vadd.xlane.f32.xlu0 %v37_v3 }
  0x9a   :  { %v39_v5 = vpop.xlane.xlu0 %38 }
  0x9b   :  { %v42_v6 = vadd.f32 %v41_v4, %v39_v5 }
  0x9d   :  { %44 = vst.msk [vmem:[%s110_s3] sm:$0xff] %vm43_vm1, %v42_v6 }
  0x9e   :  { %49 = vsyncpa [#allocation4], 1 }

</bundles_post_ra>
